<compile_context>
chip_gen: v5e
topology: v5e:2x2
jax: 0.10.0
libtpu: 0.0.40
codegen_flags: <defaults>
</compile_context>

<pallas_src>
import functools

import jax
import jax.numpy as jnp
from jax.experimental import pallas as pl
from jax.experimental.pallas import tpu as pltpu


def _textcnn_kernel(max_fs, x_ref, w_ref, bm_ref, fcw_ref, fcb_ref, out_ref):
    """Fused TextCNN forward for one batch tile.

    x_ref   : (tb, L, E)            bf16
    w_ref   : (max_fs*E, n*F)       bf16  (BN scale folded, zero rows past fs_b)
    bm_ref  : (L, n*F)              f32   (BN shift on valid t, -1e30 otherwise)
    fcw_ref : (n*F, num_labels)     bf16
    fcb_ref : (1, num_labels)       f32
    out_ref : (tb, 1, num_labels)   f32
    """
    tb, L, E = x_ref.shape
    NF = bm_ref.shape[1]

    x = x_ref[...]                                            # (tb, L, E) bf16

    # im2col along the lane axis: column block i holds x[:, t + i, :].
    # Rows past the end are zero; those time steps are killed by the bias-mask
    # before the max-pool, so partial windows never leak into the result.
    if max_fs > 1:
        xpad = jnp.concatenate(
            [x, jnp.zeros((tb, max_fs - 1, E), x.dtype)], axis=1)
    else:
        xpad = x
    x_cat = jnp.concatenate([xpad[:, i:i + L, :] for i in range(max_fs)],
                            axis=-1)                          # (tb, L, max_fs*E)

    # One MXU matmul for every branch at once: K = max_fs*E, N = n*F.
    acc = jnp.dot(x_cat.reshape(tb * L, max_fs * E), w_ref[...],
                  preferred_element_type=jnp.float32)         # (tb*L, n*F)

    # Folded BN shift + time-validity mask (-1e30 => ReLU gives 0) + ReLU.
    y = jnp.maximum(acc.reshape(tb, L, NF) + bm_ref[...][None], 0.0)

    # Global max-pool over time (ReLU output >= 0, masked positions are 0).
    pooled = jnp.max(y, axis=1)                               # (tb, n*F) f32

    # Final Linear (fc bias added once per tile).
    fcw = fcw_ref[...]
    logits = jnp.dot(pooled.astype(fcw.dtype), fcw,
                     preferred_element_type=jnp.float32) + fcb_ref[...]
    out_ref[...] = logits[:, None, :].astype(out_ref.dtype)


def _pick_batch_tile(B, cap=8):
    """Largest batch tile <= cap dividing B that still gives >= 2 grid steps."""
    for tb in range(min(B, cap), 0, -1):
        if B % tb == 0 and B // tb >= 2:
            return tb
    return B  # B == 1: single step over the whole batch


@functools.partial(jax.jit, static_argnames=("filter_sizes", "eps"))
def textcnn_forward(x, conv_ws, bn_gammas, bn_betas, bn_means, bn_vars,
                    fc_w, fc_b, *, filter_sizes, eps=1e-5):
    """x: (B, L, E); conv_ws[i]: (F, 1, fs_i, E); fc_w: (num_labels, n*F)."""
    B, L, E = x.shape
    n = len(filter_sizes)
    max_fs = max(filter_sizes)
    assert L >= max_fs, "sequence length must cover the largest filter size"
    num_filters = conv_ws[0].shape[0]
    NF = n * num_filters
    num_labels = fc_w.shape[0]

    # --- Pack conv weights (fold BN scale, pad each branch to max_fs) -------
    w_blocks, shifts = [], []
    for bi, fs in enumerate(filter_sizes):
        scale = bn_gammas[bi] / jnp.sqrt(bn_vars[bi] + eps)            # (F,)
        shifts.append(bn_betas[bi] - bn_means[bi] * scale)             # (F,)
        w = conv_ws[bi][:, 0, :, :].astype(jnp.float32)                # (F,fs,E)
        w = w * scale[:, None, None]                                   # exact fold
        w = jnp.transpose(w, (1, 2, 0))                                # (fs,E,F)
        if fs < max_fs:
            w = jnp.concatenate(
                [w, jnp.zeros((max_fs - fs, E, num_filters), jnp.float32)],
                axis=0)
        w_blocks.append(w)                                             # (max_fs,E,F)
    w_packed = jnp.concatenate(w_blocks, axis=-1)                      # (max_fs,E,NF)
    w_packed = w_packed.reshape(max_fs * E, NF).astype(jnp.bfloat16)

    # --- Bias-mask: BN shift on valid time steps, -1e30 on invalid ones -----
    t_idx = jnp.arange(L, dtype=jnp.int32)[:, None]                    # (L,1)
    bm_cols = []
    for bi, fs in enumerate(filter_sizes):
        valid = t_idx <= (L - fs)                                      # (L,1)
        bm_cols.append(jnp.where(valid, shifts[bi][None, :].astype(jnp.float32),
                                 jnp.float32(-1e30)))                  # (L,F)
    biasmask = jnp.concatenate(bm_cols, axis=1)                        # (L,NF)

    fcw = jnp.transpose(fc_w).astype(jnp.bfloat16)                     # (NF,labels)
    fcb = fc_b.reshape(1, num_labels).astype(jnp.float32)
    x_bf = x.astype(jnp.bfloat16)

    tb = _pick_batch_tile(B)
    grid = (B // tb,)

    out3 = pl.pallas_call(
        functools.partial(_textcnn_kernel, max_fs),
        out_shape=jax.ShapeDtypeStruct((B, 1, num_labels), jnp.float32),
        grid_spec=pltpu.PrefetchScalarGridSpec(
            num_scalar_prefetch=0,
            grid=grid,
            in_specs=[
                pl.BlockSpec((tb, L, E), lambda i: (i, 0, 0)),
                pl.BlockSpec((max_fs * E, NF), lambda i: (0, 0)),
                pl.BlockSpec((L, NF), lambda i: (0, 0)),
                pl.BlockSpec((NF, num_labels), lambda i: (0, 0)),
                pl.BlockSpec((1, num_labels), lambda i: (0, 0)),
            ],
            out_specs=pl.BlockSpec((tb, 1, num_labels), lambda i: (i, 0, 0)),
        ),
        compiler_params=pltpu.CompilerParams(
            dimension_semantics=("parallel",),
            vmem_limit_bytes=32 * 1024 * 1024),   # fits v7x's 64 MiB with headroom
    )(x_bf, w_packed, biasmask, fcw, fcb)
    return out3[:, 0, :]


def _reference(x, conv_ws, gammas, betas, means, vars_, fc_w, fc_b,
               filter_sizes, eps=1e-5):
    """Pure-JAX reference matching the PyTorch forward (eval-mode BN)."""
    xi = x[:, None, :, :].astype(jnp.float32)                 # (B, 1, L, E)
    feats = []
    for bi, fs in enumerate(filter_sizes):
        y = jax.lax.conv_general_dilated(
            xi, conv_ws[bi].astype(jnp.float32),
            window_strides=(1, 1), padding="VALID",
            dimension_numbers=("NCHW", "OIHW", "NCHW"),
            precision=jax.lax.Precision.HIGHEST)              # (B, F, Lout, 1)
        scale = gammas[bi] / jnp.sqrt(vars_[bi] + eps)
        shift = betas[bi] - means[bi] * scale
        y = y * scale.reshape(1, -1, 1, 1) + shift.reshape(1, -1, 1, 1)
        y = jnp.maximum(y, 0.0)[:, :, :, 0]                   # (B, F, Lout)
        feats.append(jnp.max(y, axis=2))                      # (B, F)
    feat = jnp.concatenate(feats, axis=1)                     # (B, n*F)
    return (jnp.dot(feat, fc_w.T.astype(jnp.float32),
                    precision=jax.lax.Precision.HIGHEST)
            + fc_b.astype(jnp.float32))


if __name__ == "__main__":
    key = jax.random.PRNGKey(0)
    keys = jax.random.split(key, 16)

    B, L, E = 2, 16, 32
    num_filters = 8
    filter_sizes = (2, 3, 4)
    num_labels = 4
    n = len(filter_sizes)

    x = jax.random.normal(keys[0], (B, L, E), dtype=jnp.float32)

    conv_ws, gammas, betas, means, vars_ = [], [], [], [], []
    for bi, fs in enumerate(filter_sizes):
        bound = (1.0 / (1 * fs * E)) ** 0.5
        conv_ws.append(jax.random.uniform(
            keys[1 + bi], (num_filters, 1, fs, E), jnp.float32, -bound, bound))
        gammas.append(jax.random.uniform(
            keys[4 + bi], (num_filters,), jnp.float32, 0.5, 1.5))
        betas.append(jax.random.uniform(
            keys[7 + bi], (num_filters,), jnp.float32, -0.5, 0.5))
        means.append(0.1 * jax.random.normal(
            keys[10 + bi], (num_filters,), jnp.float32))
        vars_.append(jax.random.uniform(
            keys[13 + bi], (num_filters,), jnp.float32, 0.5, 1.5))

    f_total = num_filters * n
    k_fc_w, k_fc_b = jax.random.split(keys[15])
    bound_fc = (1.0 / f_total) ** 0.5
    fc_w = jax.random.uniform(k_fc_w, (num_labels, f_total), jnp.float32,
                              -bound_fc, bound_fc)
    fc_b = jax.random.uniform(k_fc_b, (num_labels,), jnp.float32,
                              -bound_fc, bound_fc)

    out = textcnn_forward(x, conv_ws, gammas, betas, means, vars_,
                          fc_w, fc_b, filter_sizes=filter_sizes)
    out = jax.block_until_ready(out)

    ref = _reference(x, conv_ws, gammas, betas, means, vars_,
                     fc_w, fc_b, filter_sizes)

    assert out.shape == (B, num_labels)
    # bf16 MXU operands (per perf feedback) vs. an f32 HIGHEST reference:
    # 2e-2 tolerance covers the bf16 input-rounding error comfortably.
    assert jnp.allclose(out, ref, atol=2e-2, rtol=2e-2), (out, ref)

    print("KERNEL_OK")
</pallas_src>

<mosaic_0001>
module attributes {stable_mosaic.version = 11 : i64} {
  func.func @_textcnn_kernel(%arg0: i32, %arg1: memref<1x16x32xbf16, #tpu.memory_space<vmem>>, %arg2: memref<128x24xbf16, #tpu.memory_space<vmem>>, %arg3: memref<16x24xf32, #tpu.memory_space<vmem>>, %arg4: memref<24x4xbf16, #tpu.memory_space<vmem>>, %arg5: memref<1x4xf32, #tpu.memory_space<vmem>>, %arg6: memref<1x1x4xf32, #tpu.memory_space<vmem>>) attributes {dimension_semantics = [#tpu.dimension_semantics<parallel>], iteration_bounds = array<i64: 2>, scalar_prefetch = 0 : i64, scratch_operands = 0 : i64, tpu.core_type = #tpu.core_type<tc>, window_params = [{transform_indices = @transform_0, window_bounds = array<i64: 1, 16, 32>}, {pipeline_mode = #tpu.pipeline_mode<synchronous>, transform_indices = @transform_1, window_bounds = array<i64: 128, 24>}, {pipeline_mode = #tpu.pipeline_mode<synchronous>, transform_indices = @transform_2, window_bounds = array<i64: 16, 24>}, {pipeline_mode = #tpu.pipeline_mode<synchronous>, transform_indices = @transform_3, window_bounds = array<i64: 24, 4>}, {pipeline_mode = #tpu.pipeline_mode<synchronous>, transform_indices = @transform_4, window_bounds = array<i64: 1, 4>}, {transform_indices = @transform_5, window_bounds = array<i64: 1, 1, 4>}]} {
    %c0 = arith.constant 0 : index
    %c0_0 = arith.constant 0 : index
    %c0_1 = arith.constant 0 : index
    %0 = vector.load %arg1[%c0, %c0_0, %c0_1] : memref<1x16x32xbf16, #tpu.memory_space<vmem>>, vector<1x16x32xbf16>
    %cst = arith.constant 0.000000e+00 : bf16
    %1 = vector.broadcast %cst : bf16 to vector<1x3x32xbf16>
    %2 = tpu.concatenate %0, %1 in 1 : vector<1x16x32xbf16>, vector<1x3x32xbf16> -> vector<1x19x32xbf16>
    %3 = vector.extract_strided_slice %2 {offsets = [0, 0, 0], sizes = [1, 16, 32], strides = [1, 1, 1]} : vector<1x19x32xbf16> to vector<1x16x32xbf16>
    %4 = vector.extract_strided_slice %2 {offsets = [0, 1, 0], sizes = [1, 16, 32], strides = [1, 1, 1]} : vector<1x19x32xbf16> to vector<1x16x32xbf16>
    %5 = vector.extract_strided_slice %2 {offsets = [0, 2, 0], sizes = [1, 16, 32], strides = [1, 1, 1]} : vector<1x19x32xbf16> to vector<1x16x32xbf16>
    %6 = vector.extract_strided_slice %2 {offsets = [0, 3, 0], sizes = [1, 16, 32], strides = [1, 1, 1]} : vector<1x19x32xbf16> to vector<1x16x32xbf16>
    %7 = tpu.concatenate %3, %4, %5, %6 in 2 : vector<1x16x32xbf16>, vector<1x16x32xbf16>, vector<1x16x32xbf16>, vector<1x16x32xbf16> -> vector<1x16x128xbf16>
    %8 = vector.shape_cast %7 : vector<1x16x128xbf16> to vector<16x128xbf16>
    %c0_2 = arith.constant 0 : index
    %c0_3 = arith.constant 0 : index
    %9 = vector.load %arg2[%c0_2, %c0_3] : memref<128x24xbf16, #tpu.memory_space<vmem>>, vector<128x24xbf16>
    %cst_4 = arith.constant dense<0.000000e+00> : vector<16x24xf32>
    %10 = tpu.matmul %8, %9, %cst_4 {dimension_numbers = #tpu.dot_dimension_numbers<[1], [0], [0], [1], [0, 0, 1, 1], [], []>} : vector<16x128xbf16>, vector<128x24xbf16>, vector<16x24xf32> -> vector<16x24xf32>
    %11 = vector.shape_cast %10 : vector<16x24xf32> to vector<1x16x24xf32>
    %c0_5 = arith.constant 0 : index
    %c0_6 = arith.constant 0 : index
    %12 = vector.load %arg3[%c0_5, %c0_6] : memref<16x24xf32, #tpu.memory_space<vmem>>, vector<16x24xf32>
    %13 = vector.shape_cast %12 : vector<16x24xf32> to vector<1x16x24xf32>
    %14 = arith.addf %11, %13 : vector<1x16x24xf32>
    %cst_7 = arith.constant 0.000000e+00 : f32
    %15 = vector.broadcast %cst_7 : f32 to vector<1x16x24xf32>
    %16 = arith.maximumf %14, %15 : vector<1x16x24xf32>
    %cst_8 = arith.constant dense<0xFF800000> : vector<1x24xf32>
    %17 = vector.multi_reduction <maximumf>, %16, %cst_8 [1] : vector<1x16x24xf32> to vector<1x24xf32>
    %c0_9 = arith.constant 0 : index
    %c0_10 = arith.constant 0 : index
    %18 = vector.load %arg4[%c0_9, %c0_10] : memref<24x4xbf16, #tpu.memory_space<vmem>>, vector<24x4xbf16>
    %19 = arith.truncf %17 : vector<1x24xf32> to vector<1x24xbf16>
    %cst_11 = arith.constant dense<0.000000e+00> : vector<1x4xf32>
    %20 = tpu.matmul %19, %18, %cst_11 {dimension_numbers = #tpu.dot_dimension_numbers<[1], [0], [0], [1], [0, 0, 1, 1], [], []>} : vector<1x24xbf16>, vector<24x4xbf16>, vector<1x4xf32> -> vector<1x4xf32>
    %c0_12 = arith.constant 0 : index
    %c0_13 = arith.constant 0 : index
    %21 = vector.load %arg5[%c0_12, %c0_13] : memref<1x4xf32, #tpu.memory_space<vmem>>, vector<1x4xf32>
    %22 = arith.addf %20, %21 : vector<1x4xf32>
    %23 = vector.shape_cast %22 : vector<1x4xf32> to vector<1x1x4xf32>
    %c0_14 = arith.constant 0 : index
    %c0_15 = arith.constant 0 : index
    %c0_16 = arith.constant 0 : index
    %24 = vector.load %arg6[%c0_14, %c0_15, %c0_16] : memref<1x1x4xf32, #tpu.memory_space<vmem>>, vector<1x1x4xf32>
    tpu.vector_store %arg6[%c0_14, %c0_15, %c0_16], %23 {strides = array<i32>} : memref<1x1x4xf32, #tpu.memory_space<vmem>>, vector<1x1x4xf32>,
    return
  }
  func.func @transform_0(%arg0: i32) -> (i32, i32, i32) {
    %c0_i32 = arith.constant 0 : i32
    %c0_i32_0 = arith.constant 0 : i32
    %c0_i32_1 = arith.constant 0 : i32
    return %arg0, %c0_i32, %c0_i32_0 : i32, i32, i32
  }
  func.func @transform_1(%arg0: i32) -> (i32, i32) {
    %c0_i32 = arith.constant 0 : i32
    %c0_i32_0 = arith.constant 0 : i32
    %c0_i32_1 = arith.constant 0 : i32
    return %c0_i32, %c0_i32_0 : i32, i32
  }
  func.func @transform_2(%arg0: i32) -> (i32, i32) {
    %c0_i32 = arith.constant 0 : i32
    %c0_i32_0 = arith.constant 0 : i32
    %c0_i32_1 = arith.constant 0 : i32
    return %c0_i32, %c0_i32_0 : i32, i32
  }
  func.func @transform_3(%arg0: i32) -> (i32, i32) {
    %c0_i32 = arith.constant 0 : i32
    %c0_i32_0 = arith.constant 0 : i32
    %c0_i32_1 = arith.constant 0 : i32
    return %c0_i32, %c0_i32_0 : i32, i32
  }
  func.func @transform_4(%arg0: i32) -> (i32, i32) {
    %c0_i32 = arith.constant 0 : i32
    %c0_i32_0 = arith.constant 0 : i32
    %c0_i32_1 = arith.constant 0 : i32
    return %c0_i32, %c0_i32_0 : i32, i32
  }
  func.func @transform_5(%arg0: i32) -> (i32, i32, i32) {
    %c0_i32 = arith.constant 0 : i32
    %c0_i32_0 = arith.constant 0 : i32
    %c0_i32_1 = arith.constant 0 : i32
    return %arg0, %c0_i32, %c0_i32_0 : i32, i32, i32
  }
}

</mosaic_0001>

<bundles_post_ra>
// kernel: textcnn_forward.1
= control target key start
LH: loop header
LB: loop body
LE: loop exit
PB: predicated region body
PF: predicated region fallthrough
CT: control target
= control target key end

     0   :  { %10 = vsyncpa [#allocation3], 0  ;;  %s797_s0 = inlined_call_operand.vmem [shape: bf16[2,16,32], index: 0, kind: input, shape index: {}]   ;;  %s798_s1 = inlined_call_operand.vmem [shape: bf16[128,24], index: 1, kind: input, shape index: {}]   ;;  %s799_s2 = inlined_call_operand.vmem [shape: f32[16,24], index: 2, kind: input, shape index: {}]   ;;  %s800_s3 = inlined_call_operand.vmem [shape: bf16[24,4], index: 3, kind: input, shape index: {}]   ;;  %s801_s4 = inlined_call_operand.vmem [shape: f32[1,4], index: 4, kind: input, shape index: {}]   ;;  %s802_s5 = inlined_call_operand.hbm [shape: f32[2,1,4], index: 5, kind: output, shape index: {}]  }
   0x1   :  { %12 = vsyncpa [#allocation3 + $0x1], 0  ;;  %s673_s18 = smov 0   ;;  %s675_s19 = smov 0  }
   0x2   :  { %s677_s20 = smov 0   ;;  %s679_s21 = smov 0  }
   0x3 LB: > { %s694_s22 = sadd.s32 4294967295, %s637_s21   ;;  %s472_s23 = sadd.s32 4294967294, %s637_s21   ;;  %s637_s21 = sphi %s679_s21, %s808_s21   ;;  %s633_s20 = sphi %s677_s20, %s807_s20   ;;  %s629_s19 = sphi %s675_s19, %s806_s19   ;;  %s625_s18 = sphi %s673_s18, %s805_s18  }
   0x4   : > { %s698_s24 = sadd.s32 1, %s637_s21   ;;  %s135_s25 = sadd.s32 1, %s633_s20 }
   0x5   : > { %s132_s26 = ssub.s32 %s637_s21, %s698_s24  ;;  %p145_p0 = scmp.ne.s32.totalorder %s633_s20, %s629_s19 }
   0x6   : > { %p133_p1 = scmp.eq.s32.totalorder %s132_s26, 0  ;;  %p146_p2 = scmp.eq.s32.totalorder %s694_s22, 1 }
   0x7   : > { %p151_p3 = scmp.ne.s32.totalorder %s629_s19, %s625_s18  ;;  %p152_p4 = scmp.eq.s32.totalorder %s472_s23, 1 }
   0x8   : > { %s709_s27 = scalar_select %p133_p1, %s633_s20, %s135_s25  }
   0x9   : > { %p711_p5 = por %p146_p2, %p145_p0  ;;  %p715_p6 = por %p152_p4, %p151_p3 }
   0xa   : > { %p475_p7 = scmp.ge.s32.totalorder %s637_s21, 1  ;;  %p190_p8 = scmp.lt.s32.totalorder %s637_s21, 3 }
   0xc   : > { %p191_p9 = pnand %p475_p7, %p190_p8 }
   0xd   : > { %p217_p10 = scmp.lt.s32.totalorder (!%p191_p9), %s694_s22, 1  ;;  %s640_s23 = smov (!%p191_p9), 32  }
   0xe   : > { %194 = sbr.rel (%p191_p9) target bundleno = 445 (0x1bd), region = 40  ;;  %s641_s25 = smov (!%p191_p9), 96  }
  0x13   : > { %s218_s30 = scalar_select %p217_p10, %s694_s22, 1  ;;  %v530_v0 = vld [vmem:[%s798_s1 + $0x38] sm:$0xff]  ;;  %v529_v1 = vld [vmem:[%s798_s1 + $0x30] sm:$0xff]  ;;  %v639_v3 = vmov 0   ;;  %v528_v8 = vld [vmem:[%s798_s1 + $0x28] sm:$0xff]  ;;  %vm246_vm2 = vcmask 1046528  }
  0x14   : > { %338 = vmatpush.bf16.msra.mxu0 %v530_v0  ;;  %v259_v4 = vrot.slane %v639_v3, 2  ;;  %v241_v7 = vrot.slane %v639_v3, 1  ;;  %vm230_vm0 = vsmask.f32 7424  ;;  %vm252_vm1 = vsmask.f32 6400 }
  0x15   : > { %s521_s8 = sshll.u32 %s218_s30, 3  ;;  %v527_v15 = vld [vmem:[%s798_s1 + $0x20] sm:$0xff]  ;;  %v526_v19 = vld [vmem:[%s798_s1 + $0x18] sm:$0xff]  ;;  %v525_v21 = vld [vmem:[%s798_s1 + $0x10] sm:$0xff]  ;;  %vm264_vm3 = vcmask 261120   ;;  %vm267_vm4 = vcmask 523264  }
  0x16   : > { %s221_s13 = scalar_lea.vmem %s797_s0, %s521_s8  ;;  %v260_v12 = vor.u32 %v259_v4, %v241_v7  ;;  %s642_s8 = smov 64   ;;  %v524_v22 = vld [vmem:[%s798_s1 + $0x8] sm:$0xff]  ;;  %v523_v23 = vld [vmem:[%s798_s1] sm:$0xff]  ;;  %vm270_vm5 = vcmask 785408   ;;  %vm385_vm6 = vcmask 1043456   ;;  %vm358_vm7 = vcmask 195584  }
  0x17   : > { %v522_v2 = vld [vmem:[%s221_s13] sm:$0xff]  ;;  %v370_v30 = vld [vmem:[%s800_s3 + $0x8] sm:$0xf]  ;;  %s215_s30 = sand.u32 1, %s629_s19   ;;  %vm402_vm8 = vcmask 24576  }
  0x18   : > { %v232_v5 = vshrl.u32 %v522_v2, 16  ;;  %v234_v6 = vshll.u32 %v522_v2, 16  ;;  %339 = vmatpush.bf16.msra.mxu0 %v529_v1  ;;  %v247_v18 = vrot.slane %v522_v2, 1  ;;  %v378_v31 = vunpack.c.l.b16 %v370_v30  ;;  %v531_v34 = vld [vmem:[%s800_s3] sm:$0xff]  ;;  %v353_v38 = vld [vmem:[%s799_s2 + $0x8] sm:$0xff]  ;;  %s216_s11 = scalar_lea.vmem [#allocation2], %s215_s30 }
  0x19   : > { %v352_v36 = vld [vmem:[%s799_s2] sm:$0xff]  ;;  %s415_s12 = sshll.u32 %s216_s11, 4  ;;  %s405_s14 = scalar_lea.sflag [#allocation3], %s215_s30  ;;  %s416_s12 = int_to_ptr.vmem [resolvable:$true] %s415_s12 }
  0x1a   : > { %v236_v9 = vrot.slane %v234_v6, 1  ;;  %v253_v10 = vrot.slane %v232_v5, 1  ;;  %v254_v11 = vrot.slane %v234_v6, 2  ;;  %v249_v20 = vsel %vm246_vm2, %v247_v18, %v241_v7  ;;  %v372_v53 = vld [vmem:[%s801_s4] sm:$0x1] }
  0x1b   : > { %v380_v32 = vpack.c.b16 %v378_v31, %v378_v31 }
  0x1c   : > { %v237_v13 = vor.u32 %v236_v9, %v232_v5  ;;  %v255_v14 = vor.u32 %v254_v11, %v253_v10  ;;  %340 = vmatpush.bf16.msra.mxu0 %v528_v8 }
  0x1d   : > { %v387_v33 = vsel %vm385_vm6, %v380_v32, 0 }
  0x1e   : > { %v242_v16 = vsel %vm230_vm0, %v237_v13, %v241_v7  ;;  %v261_v17 = vsel %vm252_vm1, %v255_v14, %v260_v12  ;;  %395 = vmatpush.bf16.msra.mxu1 %v387_v33 }
  0x1f   : > { %243 = vrot.lane.b32.xlu0 %v242_v16, %s640_s23  ;;  %262 = vrot.lane.b32.xlu1 %v261_v17, %s641_s25  ;;  %s595_s23 = scalar_lea.hbm %s802_s5, 2 }
  0x20   : > { %341 = vmatpush.bf16.msra.mxu0 %v527_v15 }
  0x22   : > { %396 = vmatpush.bf16.msra.mxu1 %v531_v34 }
  0x24   : > { %342 = vmatpush.bf16.msra.mxu0 %v526_v19 }
  0x27   : > { %250 = vrot.lane.b32.xlu0 %v249_v20, %s642_s8  ;;  %s413_s8 = scalar_lea.hbm %s802_s5, %s694_s22 }
  0x28   : > { %343 = vmatpush.bf16.msra.mxu0 %v525_v21  ;;  %s417_s13 = sshll.u32 %s413_s8, 4  ;;  %s418_s13 = int_to_ptr.hbm [resolvable:$true] %s417_s13 }
  0x29   : > { %s589_s15 = sshra.s32 %s418_s13, 4  ;;  %s590_s15 = int_to_ptr.hbm [resolvable:$true] %s589_s15 }
  0x2a   : > { %s591_s16 = scalar_lea.hbm %s590_s15, 1  ;;  %p596_p0 = scmp.lt.s32.totalorder %s590_s15, %s802_s5 }
  0x2b   : > { %p592_p11 = scmp.ne.s32.totalorder %s590_s15, %s591_s16  ;;  %p597_p1 = scmp.lt.s32.totalorder %s595_s23, %s591_s16 }
  0x2c   : > { %344 = vmatpush.bf16.msra.mxu0 %v524_v22 }
  0x2d   : > { %p593_p12 = pnand %p592_p11, %p711_p5  ;;  %p598_p2 = por %p597_p1, %p596_p0 }
  0x2f   : > { %p594_p13 = pneg %p593_p12 }
  0x30   : > { %345 = vmatpush.bf16.msra.mxu0 %v523_v23 }
  0x31   : > { %p599_p3 = pnand %p598_p2, %p594_p13 }
  0x91   : > { %v244_v24 = vpop.permute.xlu0 %243  ;;  %v263_v25 = vpop.permute.xlu1 %262 }
  0x92   : > { %v266_v26 = vsel %vm264_vm3, %v522_v2, %v244_v24 }
  0x99   : > { %v251_v27 = vpop.permute.xlu0 %250 }
  0x9a   : > { %v269_v28 = vsel %vm267_vm4, %v266_v26, %v251_v27 }
  0x9b   : > { %v272_v29 = vsel %vm270_vm5, %v269_v28, %v263_v25 }
  0x9c   : > { %346 = vmatmul.bf16.vlgmr.msra.gmra.mxu0 %v272_v29 }
 0x119   : > { %v347_v35 = vpop.f32.mrf.mxu0 }
 0x11a   : > { %v354_v37 = vadd.f32 %v352_v36, %v347_v35 }
 0x11c   : > { %v356_v40 = vmax.f32 %v354_v37, 0.0 }
 0x11e   : > { %v359_v43 = vsel %vm358_vm7, %v356_v40, -inf }
 0x121   : > { %v349_v39 = vpop.f32.mrf.mxu0 }
 0x122   : > { %v355_v41 = vadd.f32 %v353_v38, %v349_v39 }
 0x124   : > { %v357_v42 = vmax.f32 %v355_v41, 0.0 }
 0x126   : > { %v360_v44 = vsel %vm358_vm7, %v357_v42, -inf }
 0x127   : > { %v361_v45 = vmax.f32 %v359_v43, %v360_v44 }
 0x129   : > { %v362_v46 = vrot.slane %v361_v45, 4 }
 0x12b   : > { %v363_v47 = vmax.f32 %v361_v45, %v362_v46 }
 0x12d   : > { %v364_v48 = vrot.slane %v363_v47, 2 }
 0x12f   : > { %v365_v49 = vmax.f32 %v363_v47, %v364_v48 }
 0x131   : > { %v366_v50 = vrot.slane %v365_v49, 1 }
 0x133   : > { %v367_v51 = vmax.f32 %v365_v49, %v366_v50 }
 0x135   : > { %v371_v52 = vpack.c.bf16 %v367_v51, %v367_v51 }
 0x137   : > { %518 = vmatmul.msk.bf16.vlgmr.msra.gmra.mxu1 %vm358_vm7, %v371_v52 }
 0x1b4   : > { %v398_v54 = vpop.f32.mrf.mxu1 }
 0x1b5   : > { %v399_v55 = vadd.f32 %v398_v54, %v372_v53 }
 0x1b7   : > { %403 = vst.msk [vmem:[%s216_s11] sm:$0x1] %vm402_vm8, %v399_v55 }
 0x1b8   : > { %602 = shalt.err (!%p599_p3)
}
 0x1b9   : > { %532 = dma.vmem_to_hbm [thread:$0]  (%p711_p5), %s416_s12, 16, %s418_s13, %s405_s14  }
 0x1bc   : > { %v400_v56 = vpop.f32.mrf.mxu1 }
 0x1bd PF: > { %p538_p4 = scmp.ge.s32.totalorder %s637_s21, 2  ;;  %s429_s30 = sand.u32 1, %s625_s18  }
 0x1be   : > { %s430_s6 = scalar_lea.sflag [#allocation3], %s429_s30 }
 0x1bf   : > { %p535_p7 = pnand %p538_p4, %p715_p6 }
 0x1c1   : > { %p536_p8 = pneg %p535_p7 }
 0x1c3   : > { %620 = dma.done.wait (%p536_p8), %s430_s6, 16  }
 0x1c4   : > { %622 = vsyncadd (%p536_p8), %s430_s6, 4294967280  ;;  %p15_p9 = scmp.ge.s32.totalorder %s698_s24, 4   ;;  %s805_s18 = smov %s629_s19 }
 0x1c5   : > { %s806_s19 = smov %s633_s20  ;;  %s807_s20 = smov %s709_s27 }
 0x1c6   : > { %s808_s21 = smov %s698_s24  ;;  %17 = sbr.rel (!%p15_p9) target bundleno = 3 (0x3), region = 75 }
 0x1cb   :  { %435 = vsyncpa [#allocation3], 1 }
 0x1cc   :  { %437 = vsyncpa [#allocation3 + $0x1], 1 }

</bundles_post_ra>
